<compile_context>
chip_gen: v5e
topology: v5e:2x2
jax: 0.10.0
libtpu: 0.0.40
codegen_flags: <defaults>
</compile_context>

<pallas_src>
import functools

import jax
import jax.numpy as jnp
from jax.experimental import pallas as pl
from jax.experimental.pallas import tpu as pltpu

LAYERS = (32, 32, 16)
LANE = 128
TILE_B = 16384  # batch (lane-axis) tile; sweep 8192-65536 for very large batches


def mlp_kernel(x_ref,
               w1_ref, b1_ref,
               w2_ref, b2_ref,
               w3_ref, b3_ref,
               w4_ref, b4_ref,
               o_ref):
    """x_ref: (in, TILE_B); wN_ref: (out, in); bN_ref: (out, 1); o_ref: (out, TILE_B)."""

    def layer(w_ref, b_ref, h, relu=True):
        # MXU matmul with batch on the lane/N axis (fully occupied), f32 accumulate.
        z = jnp.dot(w_ref[...], h.astype(w_ref.dtype),
                    preferred_element_type=jnp.float32)
        z = z + b_ref[...]                       # (out, 1) broadcasts along lanes
        return jnp.maximum(z, 0.0) if relu else z

    h = layer(w1_ref, b1_ref, x_ref[...])        # ReLU (activation1)
    h = layer(w2_ref, b2_ref, h)                 # ReLU (activation2)
    h = layer(w3_ref, b3_ref, h)                 # ReLU (activation3)
    z = layer(w4_ref, b4_ref, h, relu=False)
    o_ref[...] = jnp.tanh(z).astype(o_ref.dtype)  # output_activation = tanh


def _default_matmul_dtype():
    """bf16 matmul operands on v6e/v7x (bf16 MXU/VPU path); f32 on v5e and older."""
    try:
        kind = jax.devices()[0].device_kind.lower()
    except Exception:
        return jnp.float32
    if ("v6" in kind) or ("v7" in kind) or ("7x" in kind):
        return jnp.bfloat16
    return jnp.float32


def _choose_tile(batch, tile_b):
    """Lane-multiple batch tile; keep >=4 grid steps for big batches (v7x megacore)."""
    b_lane = pl.cdiv(batch, LANE) * LANE
    tb = min(tile_b, b_lane)
    if b_lane >= 4 * 2048:  # big batch: cap so the grid has >= 4 steps
        tb = min(tb, pl.cdiv(b_lane // 4, LANE) * LANE)
    return max(tb, LANE)


@functools.partial(jax.jit, static_argnames=("tile_b", "matmul_dtype"))
def neural_net_forward(x, params, tile_b=TILE_B, matmul_dtype=None):
    """x: [B, input_size] f32.  params: wN [out, in] (PyTorch layout), bN [out, 1]."""
    if matmul_dtype is None:
        matmul_dtype = _default_matmul_dtype()

    B, in_size = x.shape
    out_size = params["w4"].shape[0]

    tb = _choose_tile(B, tile_b)
    b_pad = pl.cdiv(B, tb) * tb
    grid = (b_pad // tb,)

    # Single producer-side relayout: transpose -> batch on lanes, cast to matmul
    # dtype, pad ragged tail.  XLA fuses these into one pass over x (no separate
    # jnp.pad round-trip through HBM as in the previous version).
    x_t = jnp.pad(x.T.astype(matmul_dtype), ((0, 0), (0, b_pad - B)))

    operands = (
        x_t,
        params["w1"].astype(matmul_dtype), params["b1"],
        params["w2"].astype(matmul_dtype), params["b2"],
        params["w3"].astype(matmul_dtype), params["b3"],
        params["w4"].astype(matmul_dtype), params["b4"],
    )

    # Weights/biases: constant index map -> DMA'd once, VMEM-resident across steps.
    in_specs = [pl.BlockSpec((in_size, tb), lambda i: (0, i))] + \
               [pl.BlockSpec(op.shape, lambda i: (0, 0)) for op in operands[1:]]

    l0, l1, l2 = LAYERS
    flops = 2 * b_pad * (in_size * l0 + l0 * l1 + l1 * l2 + l2 * out_size)
    param_bytes = sum(int(op.size) * op.dtype.itemsize for op in operands[1:])
    cost = pl.CostEstimate(
        flops=flops,
        transcendentals=b_pad * out_size,  # tanh
        bytes_accessed=b_pad * in_size * x_t.dtype.itemsize
        + 4 * b_pad * out_size
        + param_bytes,
    )

    out_t = pl.pallas_call(
        mlp_kernel,
        out_shape=jax.ShapeDtypeStruct((out_size, b_pad), jnp.float32),
        grid=grid,
        in_specs=in_specs,
        out_specs=pl.BlockSpec((out_size, tb), lambda i: (0, i)),
        compiler_params=pltpu.CompilerParams(
            dimension_semantics=("parallel",),
            vmem_limit_bytes=32 * 1024 * 1024,
        ),
        cost_estimate=cost,
    )(*operands)

    # Back to the PyTorch-facing (B, out_size) layout; drop padded columns.
    return out_t[:, :B].T


def init_params(key, input_size, output_size, layers=LAYERS):
    """Mirror the PyTorch module: xavier_normal_ weights, PyTorch-default
    uniform(-1/sqrt(fan_in), 1/sqrt(fan_in)) biases.  Weights stored [out, in]."""
    dims = [input_size, layers[0], layers[1], layers[2], output_size]
    params = {}
    keys = jax.random.split(key, 8)
    for i in range(4):
        fan_in, fan_out = dims[i], dims[i + 1]
        std = (2.0 / (fan_in + fan_out)) ** 0.5
        w = std * jax.random.normal(keys[2 * i], (fan_out, fan_in), jnp.float32)
        bound = 1.0 / (fan_in ** 0.5)
        b = jax.random.uniform(keys[2 * i + 1], (fan_out, 1), jnp.float32,
                               minval=-bound, maxval=bound)
        params[f"w{i + 1}"] = w
        params[f"b{i + 1}"] = b
    return params


def reference_forward(x, params):
    h = jnp.maximum(x @ params["w1"].T + params["b1"].T, 0.0)
    h = jnp.maximum(h @ params["w2"].T + params["b2"].T, 0.0)
    h = jnp.maximum(h @ params["w3"].T + params["b3"].T, 0.0)
    return jnp.tanh(h @ params["w4"].T + params["b4"].T)


if __name__ == "__main__":
    key = jax.random.PRNGKey(0)
    k_param, k_x1, k_x2 = jax.random.split(key, 3)

    input_size = 8
    output_size = 4
    params = init_params(k_param, input_size, output_size)

    compute_dtype = _default_matmul_dtype()
    tol = 1e-5 if compute_dtype == jnp.float32 else 3e-2

    # Small batch (single lane tile).
    batch = 8
    x = jax.random.normal(k_x1, (batch, input_size), jnp.float32)
    out = jax.block_until_ready(neural_net_forward(x, params))
    ref = reference_forward(x, params)
    assert out.shape == (batch, output_size)
    assert jnp.allclose(out, ref, atol=tol, rtol=tol), "mismatch vs pure-JAX reference"

    # Ragged batch (exercises the pad-to-lane-multiple path).
    batch2 = 20
    x2 = jax.random.normal(k_x2, (batch2, input_size), jnp.float32)
    out2 = jax.block_until_ready(neural_net_forward(x2, params))
    ref2 = reference_forward(x2, params)
    assert out2.shape == (batch2, output_size)
    assert jnp.allclose(out2, ref2, atol=tol, rtol=tol), "mismatch vs pure-JAX reference (ragged)"

    print("KERNEL_OK")
</pallas_src>

<mosaic_0001>
module attributes {stable_mosaic.version = 11 : i64} {
  func.func @mlp_kernel(%arg0: i32, %arg1: memref<8x128xf32, #tpu.memory_space<vmem>>, %arg2: memref<32x8xf32, #tpu.memory_space<vmem>>, %arg3: memref<32x1xf32, #tpu.memory_space<vmem>>, %arg4: memref<32x32xf32, #tpu.memory_space<vmem>>, %arg5: memref<32x1xf32, #tpu.memory_space<vmem>>, %arg6: memref<16x32xf32, #tpu.memory_space<vmem>>, %arg7: memref<16x1xf32, #tpu.memory_space<vmem>>, %arg8: memref<4x16xf32, #tpu.memory_space<vmem>>, %arg9: memref<4x1xf32, #tpu.memory_space<vmem>>, %arg10: memref<4x128xf32, #tpu.memory_space<vmem>>) attributes {dimension_semantics = [#tpu.dimension_semantics<parallel>], iteration_bounds = array<i64: 1>, scalar_prefetch = 0 : i64, scratch_operands = 0 : i64, tpu.core_type = #tpu.core_type<tc>, window_params = [{transform_indices = @transform_0, window_bounds = array<i64: 8, 128>}, {pipeline_mode = #tpu.pipeline_mode<synchronous>, transform_indices = @transform_1, window_bounds = array<i64: 32, 8>}, {pipeline_mode = #tpu.pipeline_mode<synchronous>, transform_indices = @transform_2, window_bounds = array<i64: 32, 1>}, {pipeline_mode = #tpu.pipeline_mode<synchronous>, transform_indices = @transform_3, window_bounds = array<i64: 32, 32>}, {pipeline_mode = #tpu.pipeline_mode<synchronous>, transform_indices = @transform_4, window_bounds = array<i64: 32, 1>}, {pipeline_mode = #tpu.pipeline_mode<synchronous>, transform_indices = @transform_5, window_bounds = array<i64: 16, 32>}, {pipeline_mode = #tpu.pipeline_mode<synchronous>, transform_indices = @transform_6, window_bounds = array<i64: 16, 1>}, {pipeline_mode = #tpu.pipeline_mode<synchronous>, transform_indices = @transform_7, window_bounds = array<i64: 4, 16>}, {pipeline_mode = #tpu.pipeline_mode<synchronous>, transform_indices = @transform_8, window_bounds = array<i64: 4, 1>}, {transform_indices = @transform_9, window_bounds = array<i64: 4, 128>}]} {
    %c0 = arith.constant 0 : index
    %c0_0 = arith.constant 0 : index
    %0 = vector.load %arg1[%c0, %c0_0] : memref<8x128xf32, #tpu.memory_space<vmem>>, vector<8x128xf32>
    %c0_1 = arith.constant 0 : index
    %c0_2 = arith.constant 0 : index
    %1 = vector.load %arg2[%c0_1, %c0_2] : memref<32x8xf32, #tpu.memory_space<vmem>>, vector<32x8xf32>
    %cst = arith.constant dense<0.000000e+00> : vector<32x128xf32>
    %2 = tpu.matmul %1, %0, %cst {dimension_numbers = #tpu.dot_dimension_numbers<[1], [0], [0], [1], [0, 0, 1, 1], [], []>} : vector<32x8xf32>, vector<8x128xf32>, vector<32x128xf32> -> vector<32x128xf32>
    %c0_3 = arith.constant 0 : index
    %c0_4 = arith.constant 0 : index
    %3 = vector.load %arg3[%c0_3, %c0_4] : memref<32x1xf32, #tpu.memory_space<vmem>>, vector<32x1xf32>
    %4 = vector.broadcast %3 : vector<32x1xf32> to vector<32x128xf32>
    %5 = arith.addf %2, %4 : vector<32x128xf32>
    %cst_5 = arith.constant 0.000000e+00 : f32
    %6 = vector.broadcast %cst_5 : f32 to vector<32x128xf32>
    %7 = arith.maximumf %5, %6 : vector<32x128xf32>
    %c0_6 = arith.constant 0 : index
    %c0_7 = arith.constant 0 : index
    %8 = vector.load %arg4[%c0_6, %c0_7] : memref<32x32xf32, #tpu.memory_space<vmem>>, vector<32x32xf32>
    %cst_8 = arith.constant dense<0.000000e+00> : vector<32x128xf32>
    %9 = tpu.matmul %8, %7, %cst_8 {dimension_numbers = #tpu.dot_dimension_numbers<[1], [0], [0], [1], [0, 0, 1, 1], [], []>} : vector<32x32xf32>, vector<32x128xf32>, vector<32x128xf32> -> vector<32x128xf32>
    %c0_9 = arith.constant 0 : index
    %c0_10 = arith.constant 0 : index
    %10 = vector.load %arg5[%c0_9, %c0_10] : memref<32x1xf32, #tpu.memory_space<vmem>>, vector<32x1xf32>
    %11 = vector.broadcast %10 : vector<32x1xf32> to vector<32x128xf32>
    %12 = arith.addf %9, %11 : vector<32x128xf32>
    %cst_11 = arith.constant 0.000000e+00 : f32
    %13 = vector.broadcast %cst_11 : f32 to vector<32x128xf32>
    %14 = arith.maximumf %12, %13 : vector<32x128xf32>
    %c0_12 = arith.constant 0 : index
    %c0_13 = arith.constant 0 : index
    %15 = vector.load %arg6[%c0_12, %c0_13] : memref<16x32xf32, #tpu.memory_space<vmem>>, vector<16x32xf32>
    %cst_14 = arith.constant dense<0.000000e+00> : vector<16x128xf32>
    %16 = tpu.matmul %15, %14, %cst_14 {dimension_numbers = #tpu.dot_dimension_numbers<[1], [0], [0], [1], [0, 0, 1, 1], [], []>} : vector<16x32xf32>, vector<32x128xf32>, vector<16x128xf32> -> vector<16x128xf32>
    %c0_15 = arith.constant 0 : index
    %c0_16 = arith.constant 0 : index
    %17 = vector.load %arg7[%c0_15, %c0_16] : memref<16x1xf32, #tpu.memory_space<vmem>>, vector<16x1xf32>
    %18 = vector.broadcast %17 : vector<16x1xf32> to vector<16x128xf32>
    %19 = arith.addf %16, %18 : vector<16x128xf32>
    %cst_17 = arith.constant 0.000000e+00 : f32
    %20 = vector.broadcast %cst_17 : f32 to vector<16x128xf32>
    %21 = arith.maximumf %19, %20 : vector<16x128xf32>
    %c0_18 = arith.constant 0 : index
    %c0_19 = arith.constant 0 : index
    %22 = vector.load %arg8[%c0_18, %c0_19] : memref<4x16xf32, #tpu.memory_space<vmem>>, vector<4x16xf32>
    %cst_20 = arith.constant dense<0.000000e+00> : vector<4x128xf32>
    %23 = tpu.matmul %22, %21, %cst_20 {dimension_numbers = #tpu.dot_dimension_numbers<[1], [0], [0], [1], [0, 0, 1, 1], [], []>} : vector<4x16xf32>, vector<16x128xf32>, vector<4x128xf32> -> vector<4x128xf32>
    %c0_21 = arith.constant 0 : index
    %c0_22 = arith.constant 0 : index
    %24 = vector.load %arg9[%c0_21, %c0_22] : memref<4x1xf32, #tpu.memory_space<vmem>>, vector<4x1xf32>
    %25 = vector.broadcast %24 : vector<4x1xf32> to vector<4x128xf32>
    %26 = arith.addf %23, %25 : vector<4x128xf32>
    %27 = math.tanh %26 : vector<4x128xf32>
    %c0_23 = arith.constant 0 : index
    %c0_24 = arith.constant 0 : index
    %28 = vector.load %arg10[%c0_23, %c0_24] : memref<4x128xf32, #tpu.memory_space<vmem>>, vector<4x128xf32>
    tpu.vector_store %arg10[%c0_23, %c0_24], %27 {strides = array<i32>} : memref<4x128xf32, #tpu.memory_space<vmem>>, vector<4x128xf32>,
    return
  }
  func.func @transform_0(%arg0: i32) -> (i32, i32) {
    %c0_i32 = arith.constant 0 : i32
    %c0_i32_0 = arith.constant 0 : i32
    return %c0_i32, %arg0 : i32, i32
  }
  func.func @transform_1(%arg0: i32) -> (i32, i32) {
    %c0_i32 = arith.constant 0 : i32
    %c0_i32_0 = arith.constant 0 : i32
    %c0_i32_1 = arith.constant 0 : i32
    return %c0_i32, %c0_i32_0 : i32, i32
  }
  func.func @transform_2(%arg0: i32) -> (i32, i32) {
    %c0_i32 = arith.constant 0 : i32
    %c0_i32_0 = arith.constant 0 : i32
    %c0_i32_1 = arith.constant 0 : i32
    return %c0_i32, %c0_i32_0 : i32, i32
  }
  func.func @transform_3(%arg0: i32) -> (i32, i32) {
    %c0_i32 = arith.constant 0 : i32
    %c0_i32_0 = arith.constant 0 : i32
    %c0_i32_1 = arith.constant 0 : i32
    return %c0_i32, %c0_i32_0 : i32, i32
  }
  func.func @transform_4(%arg0: i32) -> (i32, i32) {
    %c0_i32 = arith.constant 0 : i32
    %c0_i32_0 = arith.constant 0 : i32
    %c0_i32_1 = arith.constant 0 : i32
    return %c0_i32, %c0_i32_0 : i32, i32
  }
  func.func @transform_5(%arg0: i32) -> (i32, i32) {
    %c0_i32 = arith.constant 0 : i32
    %c0_i32_0 = arith.constant 0 : i32
    %c0_i32_1 = arith.constant 0 : i32
    return %c0_i32, %c0_i32_0 : i32, i32
  }
  func.func @transform_6(%arg0: i32) -> (i32, i32) {
    %c0_i32 = arith.constant 0 : i32
    %c0_i32_0 = arith.constant 0 : i32
    %c0_i32_1 = arith.constant 0 : i32
    return %c0_i32, %c0_i32_0 : i32, i32
  }
  func.func @transform_7(%arg0: i32) -> (i32, i32) {
    %c0_i32 = arith.constant 0 : i32
    %c0_i32_0 = arith.constant 0 : i32
    %c0_i32_1 = arith.constant 0 : i32
    return %c0_i32, %c0_i32_0 : i32, i32
  }
  func.func @transform_8(%arg0: i32) -> (i32, i32) {
    %c0_i32 = arith.constant 0 : i32
    %c0_i32_0 = arith.constant 0 : i32
    %c0_i32_1 = arith.constant 0 : i32
    return %c0_i32, %c0_i32_0 : i32, i32
  }
  func.func @transform_9(%arg0: i32) -> (i32, i32) {
    %c0_i32 = arith.constant 0 : i32
    %c0_i32_0 = arith.constant 0 : i32
    return %c0_i32, %arg0 : i32, i32
  }
}

</mosaic_0001>

<bundles_post_ra>
// kernel: neural_net_forward.1
= control target key start
LH: loop header
LB: loop body
LE: loop exit
PB: predicated region body
PF: predicated region fallthrough
CT: control target
= control target key end

     0   :  { %vm61_vm0 = vcmask 64512   ;;  %v284_v2 = vmov 0   ;;  %vm135_vm1 = vcmask 261120   ;;  %vm233_vm2 = vcmask 130048   ;;  %s417_s0 = inlined_call_operand.vmem [shape: f32[8,128], index: 0, kind: input, shape index: {}]   ;;  %s418_s1 = inlined_call_operand.vmem [shape: f32[32,8], index: 1, kind: input, shape index: {}]   ;;  %s419_s2 = inlined_call_operand.vmem [shape: f32[32,1], index: 2, kind: input, shape index: {}]   ;;  %s420_s4 = inlined_call_operand.vmem [shape: f32[32,1], index: 4, kind: input, shape index: {}]   ;;  %s421_s8 = inlined_call_operand.vmem [shape: f32[4,1], index: 8, kind: input, shape index: {}]   ;;  %s422_s6 = inlined_call_operand.vmem [shape: f32[16,1], index: 6, kind: input, shape index: {}]   ;;  %s423_s3 = inlined_call_operand.vmem [shape: f32[32,32], index: 3, kind: input, shape index: {}]   ;;  %s424_s5 = inlined_call_operand.vmem [shape: f32[16,32], index: 5, kind: input, shape index: {}]   ;;  %s425_s7 = inlined_call_operand.vmem [shape: f32[4,16], index: 7, kind: input, shape index: {}]   ;;  %s426_s9 = inlined_call_operand.vmem [shape: f32[4,128], index: 9, kind: output, shape index: {}]  }
   0x1   :  { %v32_v0 = vld [vmem:[%s417_s0] sm:$0xff]  ;;  %280 = vset.pattern.permute.xlu1 %v284_v2  ;;  %v38_v3 = vld [vmem:[%s419_s2 + $0x8] sm:$0xff]  ;;  %279 = vset.pattern.permute.xlu0 %v284_v2  ;;  %v40_v4 = vld [vmem:[%s419_s2 + $0x18] sm:$0xff] }
   0x2   :  { %v33_v1 = vld [vmem:[%s418_s1] sm:$0xff]  ;;  %89 = vmatpush.msra.mxu0 %v32_v0  ;;  %48 = vperm.xlu1 %280, %v38_v3   ;;  %v34_v6 = vld [vmem:[%s418_s1 + $0x8] sm:$0xff]  ;;  %v39_v7 = vld [vmem:[%s419_s2 + $0x10] sm:$0xff] }
   0x3   :  { %263 = vmatmul.msk.f32.vlgmr.msra.gmra.mxu0 %vm61_vm0, %v33_v1  ;;  %58 = vperm.xlu0 %279, %v40_v4   ;;  %v37_v5 = vld [vmem:[%s419_s2] sm:$0xff]  ;;  %v35_v9 = vld [vmem:[%s418_s1 + $0x10] sm:$0xff]  ;;  %v112_v10 = vld [vmem:[%s420_s4 + $0x8] sm:$0xff] }
   0x4   :  { %281 = vset.pattern.permute.xlu2 %v284_v2  ;;  %v111_v8 = vld [vmem:[%s420_s4] sm:$0xff]  ;;  %v36_v12 = vld [vmem:[%s418_s1 + $0x18] sm:$0xff]  ;;  %v113_v27 = vld [vmem:[%s420_s4 + $0x10] sm:$0xff] }
   0x5   :  { %v227_v11 = vld [vmem:[%s421_s8] sm:$0xf]  ;;  %v114_v19 = vld [vmem:[%s420_s4 + $0x18] sm:$0xff]  ;;  %v184_v34 = vld [vmem:[%s422_s6 + $0x8] sm:$0xff] }
   0x6   :  { %v183_v13 = vld [vmem:[%s422_s6] sm:$0xff]  ;;  %132 = vperm.xlu2 %281, %v114_v19   ;;  %v110_v33 = vld [vmem:[%s423_s3 + $0x18] sm:$0xff]  ;;  %v108_v35 = vld [vmem:[%s423_s3 + $0x8] sm:$0xff] }
   0x7   :  { %v107_v32 = vld [vmem:[%s423_s3] sm:$0xff]  ;;  %v109_v36 = vld [vmem:[%s423_s3 + $0x10] sm:$0xff]  ;;  %v182_v54 = vld [vmem:[%s424_s5 + $0x8] sm:$0xff] }
   0x8   :  { %v181_v53 = vld [vmem:[%s424_s5] sm:$0xff] }
   0x9   :  { %v226_v63 = vld [vmem:[%s425_s7] sm:$0xf] }
   0xa   :  { %43 = vperm.xlu1 %280, %v37_v5  }
   0xb   :  { %264 = vmatmul.msk.f32.gmra.mxu0 %vm61_vm0, %v34_v6  ;;  %53 = vperm.xlu0 %279, %v39_v7  }
   0xe   :  { %127 = vperm.xlu2 %281, %v113_v27  }
  0x12   :  { %117 = vperm.xlu1 %280, %v111_v8  }
  0x13   :  { %265 = vmatmul.msk.f32.gmra.mxu0 %vm61_vm0, %v35_v9  ;;  %122 = vperm.xlu0 %279, %v112_v10  }
  0x16   :  { %192 = vperm.xlu2 %281, %v184_v34  }
  0x1a   :  { %230 = vperm.xlu1 %280, %v227_v11  }
  0x1b   :  { %266 = vmatmul.msk.f32.gmra.mxu0 %vm61_vm0, %v36_v12  ;;  %187 = vperm.xlu0 %279, %v183_v13  }
  0x60   :  { %v133_v38 = vpop.permute.xlu2 %132 }
  0x68   :  { %v128_v44 = vpop.permute.xlu2 %127 }
  0x70   :  { %v193_v57 = vpop.permute.xlu2 %192 }
  0x74   :  { %v49_v17 = vpop.permute.xlu1 %48 }
  0x75   :  { %v59_v16 = vpop.permute.xlu0 %58 }
  0x7c   :  { %v44_v24 = vpop.permute.xlu1 %43 }
  0x7d   :  { %v54_v20 = vpop.permute.xlu0 %53 }
  0x80   :  { %v91_v14 = vpop.f32.mrf.mxu0 }
  0x81   :  { %v92_v28 = vadd.f32 %v91_v14, %v44_v24 }
  0x83   :  { %v103_v31 = vmax.f32 %v92_v28, 0.0 }
  0x84   :  { %v118_v48 = vpop.permute.xlu1 %117 }
  0x85   :  { %v123_v43 = vpop.permute.xlu0 %122 }
  0x88   :  { %v94_v15 = vpop.f32.mrf.mxu0 }
  0x89   :  { %v95_v25 = vadd.f32 %v94_v15, %v49_v17 }
  0x8b   :  { %v104_v30 = vmax.f32 %v95_v25, 0.0 }
  0x8c   :  { %v231_v0 = vpop.permute.xlu1 %230 }
  0x8d   :  { %v188_v56 = vpop.permute.xlu0 %187 }
  0x90   :  { %v97_v18 = vpop.f32.mrf.mxu0 }
  0x91   :  { %v98_v22 = vadd.f32 %v97_v18, %v54_v20 }
  0x93   :  { %v105_v29 = vmax.f32 %v98_v22, 0.0 }
  0x98   :  { %v100_v21 = vpop.f32.mrf.mxu0 }
  0x99   :  { %v101_v23 = vadd.f32 %v100_v21, %v59_v16 }
  0x9b   :  { %v106_v26 = vmax.f32 %v101_v23, 0.0 }
  0x9d   :  { %160 = vmatpush.msra.mxu1 %v106_v26  ;;  %274 = vmatpush.msra.mxu3 %v106_v26 }
  0x9f   :  { %161 = vmatpush.msra.mxu1 %v105_v29  ;;  %275 = vmatpush.msra.mxu3 %v105_v29 }
  0xa1   :  { %162 = vmatpush.msra.mxu1 %v104_v30  ;;  %276 = vmatpush.msra.mxu3 %v104_v30 }
  0xa3   :  { %163 = vmatpush.msra.mxu1 %v103_v31  ;;  %277 = vmatpush.msra.mxu3 %v103_v31 }
  0xa4   :  { %267 = vmatmul.msk.f32.vlgmr.msra.gmra.mxu1 %vm135_vm1, %v107_v32  ;;  %270 = vmatmul.msk.f32.vlgmr.msra.gmra.mxu3 %vm135_vm1, %v110_v33 }
  0xac   :  { %268 = vmatmul.msk.f32.gmra.mxu1 %vm135_vm1, %v108_v35 }
  0xb4   :  { %269 = vmatmul.msk.f32.gmra.mxu1 %vm135_vm1, %v109_v36 }
 0x121   :  { %v165_v37 = vpop.f32.mrf.mxu1 }
 0x122   :  { %v166_v49 = vadd.f32 %v165_v37, %v118_v48 }
 0x124   :  { %v177_v52 = vmax.f32 %v166_v49, 0.0 }
 0x127   :  { %v174_v39 = vpop.f32.mrf.mxu3 }
 0x128   :  { %v175_v40 = vadd.f32 %v174_v39, %v133_v38 }
 0x129   :  { %v168_v41 = vpop.f32.mrf.mxu1 }
 0x12a   :  { %v180_v42 = vmax.f32 %v175_v40, 0.0  ;;  %v169_v46 = vadd.f32 %v168_v41, %v123_v43 }
 0x12c   :  { %213 = vmatpush.msra.mxu2 %v180_v42  ;;  %v178_v51 = vmax.f32 %v169_v46, 0.0 }
 0x131   :  { %v171_v45 = vpop.f32.mrf.mxu1 }
 0x132   :  { %v172_v47 = vadd.f32 %v171_v45, %v128_v44 }
 0x134   :  { %v179_v50 = vmax.f32 %v172_v47, 0.0 }
 0x136   :  { %214 = vmatpush.msra.mxu2 %v179_v50 }
 0x138   :  { %215 = vmatpush.msra.mxu2 %v178_v51 }
 0x13a   :  { %216 = vmatpush.msra.mxu2 %v177_v52 }
 0x13b   :  { %271 = vmatmul.msk.f32.vlgmr.msra.gmra.mxu2 %vm135_vm1, %v181_v53 }
 0x143   :  { %272 = vmatmul.msk.f32.gmra.mxu2 %vm135_vm1, %v182_v54 }
 0x1be   :  { %v218_v55 = vpop.f32.mrf.mxu2 }
 0x1bf   :  { %v219_v59 = vadd.f32 %v218_v55, %v188_v56 }
 0x1c1   :  { %v224_v62 = vmax.f32 %v219_v59, 0.0 }
 0x1c6   :  { %v221_v58 = vpop.f32.mrf.mxu2 }
 0x1c7   :  { %v222_v60 = vadd.f32 %v221_v58, %v193_v57 }
 0x1c9   :  { %v225_v61 = vmax.f32 %v222_v60, 0.0 }
 0x1cb   :  { %251 = vmatpush.msrb.mxu3 %v225_v61 }
 0x1cd   :  { %252 = vmatpush.msrb.mxu3 %v224_v62 }
 0x1ce   :  { %273 = vmatmul.msk.f32.vlgmr.msrb.gmra.mxu3 %vm233_vm2, %v226_v63 }
 0x251   :  { %v254_v1 = vpop.f32.mrf.mxu3 }
 0x252   :  { %v255_v2 = vadd.f32 %v254_v1, %v231_v0 }
 0x254   :  { %282 = vtanh.f32 %v255_v2 }
 0x25a   :  { %v283_v3 = vpop.eup %282 }
 0x25b   :  { %258 = vst [vmem:[%s426_s9] sm:$0xf] %v283_v3 }

</bundles_post_ra>
